<compile_context>
chip_gen: v7x
topology: tpu7x:2x2x1
jax: 0.10.0
libtpu: 0.0.40
codegen_flags: <defaults>
</compile_context>

<pallas_src>
import math

import jax
import jax.numpy as jnp
from jax import lax
from jax.experimental import pallas as pl
from jax.experimental.pallas import tpu as pltpu


def _round_up(x, m):
    return ((x + m - 1) // m) * m


def _gelu_exact(x):
    # nn.GELU() default is the exact (erf) formulation.
    return 0.5 * x * (1.0 + lax.erf(x * (1.0 / math.sqrt(2.0))))


# --------------------------------------------------------------------------- #
# Kernels
# --------------------------------------------------------------------------- #
def _mlp_kernel_accum_out(x_ref, w1_ref, b1_ref, w2_ref, b2_ref, o_ref):
    """f32 output path: accumulate fc2 partials directly into the resident
    output block (its block index is constant over the reduction axis j), so no
    separate f32 scratch accumulator is needed."""
    j = pl.program_id(1)

    # fc1 partial: (tm, Hp) @ (Hp, ti) -> (tm, ti), f32 accumulation on the MXU.
    h = jnp.dot(x_ref[...], w1_ref[...], preferred_element_type=jnp.float32)
    # Bias + exact GELU in f32 (each I-column block is touched exactly once).
    h = _gelu_exact(h + b1_ref[...])
    # fc2 partial: (tm, ti) @ (ti, Hp).
    partial_out = jnp.dot(h.astype(w2_ref.dtype), w2_ref[...],
                          preferred_element_type=jnp.float32)

    @pl.when(j == 0)
    def _init():
        # b2 added exactly once, on the first reduction step.
        o_ref[...] = partial_out + b2_ref[...]

    @pl.when(j > 0)
    def _accum():
        o_ref[...] += partial_out


def _mlp_kernel_scratch(x_ref, w1_ref, b1_ref, w2_ref, b2_ref, o_ref, acc_ref):
    """Narrow-output path (e.g. bf16 activations): keep an f32 VMEM accumulator
    and cast once at the end."""
    j = pl.program_id(1)

    @pl.when(j == 0)
    def _init():
        acc_ref[...] = jnp.zeros_like(acc_ref)

    h = jnp.dot(x_ref[...], w1_ref[...], preferred_element_type=jnp.float32)
    h = _gelu_exact(h + b1_ref[...])
    acc_ref[...] += jnp.dot(h.astype(w2_ref.dtype), w2_ref[...],
                            preferred_element_type=jnp.float32)

    @pl.when(j == pl.num_programs(1) - 1)
    def _finalize():
        o_ref[...] = (acc_ref[...] + b2_ref[...]).astype(o_ref.dtype)


# --------------------------------------------------------------------------- #
# Host-side helpers
# --------------------------------------------------------------------------- #
def _vmem_budget_bytes():
    """~85% of physical VMEM: ~54 MiB on v7x (64 MiB), ~108 MiB on v5e/v6e."""
    try:
        cap = int(pltpu.get_tpu_info().vmem_capacity_bytes)
    except Exception:
        cap = 56 * 1024 * 1024  # conservative fallback that works on all gens
    return int(cap * 0.85)


def _largest_div_tile(total, want):
    """Largest multiple-of-128 divisor of `total` that is <= want (>=128)."""
    want = max(128, (min(want, total) // 128) * 128)
    best = 128
    t = 128
    while t <= want:
        if total % t == 0:
            best = t
        t += 128
    return best


def prepare_gelu_mlp_params(w1, b1, w2, b2, *, compute_dtype=jnp.bfloat16):
    """Pad weights to lane-dense multiples of 128 and cast the matmul operands
    to compute_dtype ONCE (hoisted out of the per-call hot path).

    w1: (H, I), b1: (I,), w2: (I, H), b2: (H,) — weights stored pre-transposed
    (in_features, out_features) so the kernel computes x @ W, matching
    PyTorch nn.Linear semantics.
    """
    H, I = w1.shape
    Hp = _round_up(H, 128)
    Ip = _round_up(I, 128)
    cd = jnp.dtype(compute_dtype)
    w1p = jnp.pad(w1, ((0, Hp - H), (0, Ip - I))).astype(cd)
    w2p = jnp.pad(w2, ((0, Ip - I), (0, Hp - H))).astype(cd)
    b1p = jnp.pad(b1, ((0, Ip - I),)).reshape(1, Ip).astype(jnp.float32)
    b2p = jnp.pad(b2, ((0, Hp - H),)).reshape(1, Hp).astype(jnp.float32)
    return dict(w1=w1p, b1=b1p, w2=w2p, b2=b2p,
                H=H, I=I, Hp=Hp, Ip=Ip, compute_dtype=cd)


def gelu_mlp_prepared(x, params, *, tm=512, ti=512):
    """x: (..., H). params from prepare_gelu_mlp_params."""
    H, I, Hp, Ip = params["H"], params["I"], params["Hp"], params["Ip"]
    cd = params["compute_dtype"]
    orig_shape = x.shape
    out_dtype = x.dtype
    assert orig_shape[-1] == H, f"last dim {orig_shape[-1]} != hidden_dim {H}"

    x2d = x.reshape(-1, H)
    M = x2d.shape[0]

    use_scratch = jnp.dtype(out_dtype) != jnp.dtype(jnp.float32)
    in_b = cd.itemsize
    out_b = jnp.dtype(out_dtype).itemsize
    budget = _vmem_budget_bytes()

    # --- tile derivation: fit double-buffered working set into the budget ----
    ti_eff = _largest_div_tile(Ip, ti)                     # divides Ip exactly
    tm_eff = _round_up(min(max(tm, 8), max(_round_up(M, 8), 8)), 8)

    def working_set(tm_, ti_):
        ws = (2 * tm_ * Hp * in_b        # x tile (double-buffered)
              + 2 * Hp * ti_ * in_b      # W1 I-tile
              + 2 * ti_ * Hp * in_b      # W2 I-tile
              + 2 * 8 * ti_ * 4          # b1 (sublane-padded)
              + 2 * 8 * Hp * 4           # b2
              + 2 * tm_ * Hp * out_b)    # output tile
        if use_scratch:
            ws += tm_ * Hp * 4           # f32 accumulator
        return ws

    while working_set(tm_eff, ti_eff) > budget:
        if ti_eff > 128:
            ti_eff = _largest_div_tile(Ip, ti_eff - 128)   # shrink ti first
        elif tm_eff > 8:
            tm_eff = max(8, _round_up(tm_eff // 2, 8))     # then tm
        else:
            # TODO(synk): tile fc2's output (Hp) axis for very large hidden
            # dims (Hp >= 8K bf16) so the x/out/acc blocks stop scaling with Hp.
            break

    Mp = _round_up(M, tm_eff)
    xp = jnp.pad(x2d, ((0, Mp - M), (0, Hp - H))).astype(cd)

    grid = (Mp // tm_eff, Ip // ti_eff)
    n_m = grid[0]

    kernel = _mlp_kernel_scratch if use_scratch else _mlp_kernel_accum_out
    scratch = [pltpu.VMEM((tm_eff, Hp), jnp.float32)] if use_scratch else []

    cost = pl.CostEstimate(
        flops=4 * Mp * Hp * Ip,                            # two matmuls
        transcendentals=Mp * Ip,                           # one erf / hidden elem
        bytes_accessed=(Mp * Hp * in_b                     # x read once
                        + n_m * 2 * Hp * Ip * in_b         # W1+W2 per M tile
                        + Ip * 4 + Hp * 4                  # biases
                        + Mp * Hp * out_b),                # output write
    )

    out = pl.pallas_call(
        kernel,
        out_shape=jax.ShapeDtypeStruct((Mp, Hp), out_dtype),
        grid_spec=pltpu.PrefetchScalarGridSpec(
            num_scalar_prefetch=0,
            grid=grid,
            in_specs=[
                pl.BlockSpec((tm_eff, Hp), lambda i, j: (i, 0)),   # x tile
                pl.BlockSpec((Hp, ti_eff), lambda i, j: (0, j)),   # W1 I-tile
                pl.BlockSpec((1, ti_eff), lambda i, j: (0, j)),    # b1 I-tile
                pl.BlockSpec((ti_eff, Hp), lambda i, j: (j, 0)),   # W2 I-tile
                pl.BlockSpec((1, Hp), lambda i, j: (0, 0)),        # b2
            ],
            out_specs=pl.BlockSpec((tm_eff, Hp), lambda i, j: (i, 0)),
            scratch_shapes=scratch,
        ),
        compiler_params=pltpu.CompilerParams(
            dimension_semantics=("parallel", "arbitrary"),
            vmem_limit_bytes=int(budget),
        ),
        cost_estimate=cost,
    )(xp, params["w1"], params["b1"], params["w2"], params["b2"])

    return out[:M, :H].reshape(orig_shape)


def gelu_mlp(x, w1, b1, w2, b2, *, tm=512, ti=512, compute_dtype=jnp.bfloat16):
    """Convenience one-shot wrapper.  For repeated calls, hoist
    prepare_gelu_mlp_params() and call gelu_mlp_prepared() directly."""
    params = prepare_gelu_mlp_params(w1, b1, w2, b2, compute_dtype=compute_dtype)
    return gelu_mlp_prepared(x, params, tm=tm, ti=ti)


# --------------------------------------------------------------------------- #
# Reference + test
# --------------------------------------------------------------------------- #
def init_params(key, hidden_dim, exp_factor=4.0):
    """Deterministic init mirroring nn.Linear's kaiming-uniform defaults."""
    inner = int(hidden_dim * exp_factor)
    k1, k2, k3, k4 = jax.random.split(key, 4)
    bound1 = 1.0 / math.sqrt(hidden_dim)
    bound2 = 1.0 / math.sqrt(inner)
    # Stored as (in_features, out_features) — i.e. PyTorch weight transposed.
    w1 = jax.random.uniform(k1, (hidden_dim, inner), jnp.float32, -bound1, bound1)
    b1 = jax.random.uniform(k2, (inner,), jnp.float32, -bound1, bound1)
    w2 = jax.random.uniform(k3, (inner, hidden_dim), jnp.float32, -bound2, bound2)
    b2 = jax.random.uniform(k4, (hidden_dim,), jnp.float32, -bound2, bound2)
    return w1, b1, w2, b2


def reference(x, w1, b1, w2, b2):
    h = _gelu_exact(x @ w1 + b1)
    return h @ w2 + b2


if __name__ == "__main__":
    hidden_dim = 32
    exp_factor = 4.0
    batch, seq = 2, 8

    key = jax.random.PRNGKey(0)
    kx, kp = jax.random.split(key)
    x = jax.random.normal(kx, (batch, seq, hidden_dim), jnp.float32)
    w1, b1, w2, b2 = init_params(kp, hidden_dim, exp_factor)

    ref = reference(x, w1, b1, w2, b2)

    # 1) Exact-f32 mode: bit-for-bit-class parity with the fp32 PyTorch module.
    out_f32 = gelu_mlp(x, w1, b1, w2, b2, compute_dtype=jnp.float32)
    out_f32 = jax.block_until_ready(out_f32)
    assert out_f32.shape == x.shape
    assert jnp.allclose(out_f32, ref, atol=1e-5, rtol=1e-5), \
        f"f32 max err {jnp.max(jnp.abs(out_f32 - ref))}"

    # 2) Default bf16-MXU mode (f32 accumulation/GELU/bias): looser tolerance.
    out_bf16 = gelu_mlp(x, w1, b1, w2, b2)
    out_bf16 = jax.block_until_ready(out_bf16)
    assert out_bf16.shape == x.shape
    assert jnp.allclose(out_bf16, ref, atol=2e-2, rtol=2e-2), \
        f"bf16 max err {jnp.max(jnp.abs(out_bf16 - ref))}"

    print("KERNEL_OK")
</pallas_src>

<mosaic_0001>
module attributes {stable_mosaic.version = 11 : i64} {
  func.func @_mlp_kernel_accum_out(%arg0: i32, %arg1: i32, %arg2: memref<16x128xf32, #tpu.memory_space<vmem>>, %arg3: memref<128x128xf32, #tpu.memory_space<vmem>>, %arg4: memref<1x128xf32, #tpu.memory_space<vmem>>, %arg5: memref<128x128xf32, #tpu.memory_space<vmem>>, %arg6: memref<1x128xf32, #tpu.memory_space<vmem>>, %arg7: memref<16x128xf32, #tpu.memory_space<vmem>>) attributes {dimension_semantics = [#tpu.dimension_semantics<parallel>, #tpu.dimension_semantics<arbitrary>], iteration_bounds = array<i64: 1, 1>, scalar_prefetch = 0 : i64, scratch_operands = 0 : i64, tpu.core_type = #tpu.core_type<tc>, window_params = [{transform_indices = @transform_0, window_bounds = array<i64: 16, 128>}, {transform_indices = @transform_1, window_bounds = array<i64: 128, 128>}, {transform_indices = @transform_2, window_bounds = array<i64: 1, 128>}, {transform_indices = @transform_3, window_bounds = array<i64: 128, 128>}, {pipeline_mode = #tpu.pipeline_mode<synchronous>, transform_indices = @transform_4, window_bounds = array<i64: 1, 128>}, {transform_indices = @transform_5, window_bounds = array<i64: 16, 128>}]} {
    %c0 = arith.constant 0 : index
    %c0_0 = arith.constant 0 : index
    %0 = vector.load %arg2[%c0, %c0_0] : memref<16x128xf32, #tpu.memory_space<vmem>>, vector<16x128xf32>
    %c0_1 = arith.constant 0 : index
    %c0_2 = arith.constant 0 : index
    %1 = vector.load %arg3[%c0_1, %c0_2] : memref<128x128xf32, #tpu.memory_space<vmem>>, vector<128x128xf32>
    %cst = arith.constant dense<0.000000e+00> : vector<16x128xf32>
    %2 = tpu.matmul %0, %1, %cst {dimension_numbers = #tpu.dot_dimension_numbers<[1], [0], [0], [1], [0, 0, 1, 1], [], []>} : vector<16x128xf32>, vector<128x128xf32>, vector<16x128xf32> -> vector<16x128xf32>
    %c0_3 = arith.constant 0 : index
    %c0_4 = arith.constant 0 : index
    %3 = vector.load %arg4[%c0_3, %c0_4] : memref<1x128xf32, #tpu.memory_space<vmem>>, vector<1x128xf32>
    %4 = vector.broadcast %3 : vector<1x128xf32> to vector<16x128xf32>
    %5 = arith.addf %2, %4 : vector<16x128xf32>
    %cst_5 = arith.constant 5.000000e-01 : f32
    %6 = vector.broadcast %cst_5 : f32 to vector<16x128xf32>
    %7 = arith.mulf %6, %5 : vector<16x128xf32>
    %cst_6 = arith.constant 0.707106769 : f32
    %8 = vector.broadcast %cst_6 : f32 to vector<16x128xf32>
    %9 = arith.mulf %5, %8 : vector<16x128xf32>
    %10 = math.erf %9 : vector<16x128xf32>
    %cst_7 = arith.constant 1.000000e+00 : f32
    %11 = vector.broadcast %cst_7 : f32 to vector<16x128xf32>
    %12 = arith.addf %11, %10 : vector<16x128xf32>
    %13 = arith.mulf %7, %12 : vector<16x128xf32>
    %c0_8 = arith.constant 0 : index
    %c0_9 = arith.constant 0 : index
    %14 = vector.load %arg5[%c0_8, %c0_9] : memref<128x128xf32, #tpu.memory_space<vmem>>, vector<128x128xf32>
    %cst_10 = arith.constant dense<0.000000e+00> : vector<16x128xf32>
    %15 = tpu.matmul %13, %14, %cst_10 {dimension_numbers = #tpu.dot_dimension_numbers<[1], [0], [0], [1], [0, 0, 1, 1], [], []>} : vector<16x128xf32>, vector<128x128xf32>, vector<16x128xf32> -> vector<16x128xf32>
    %c0_i32 = arith.constant 0 : i32
    %16 = arith.cmpi eq, %arg1, %c0_i32 : i32
    %17 = arith.extui %16 : i1 to i32
    %c0_i32_11 = arith.constant 0 : i32
    %18 = arith.cmpi ne, %17, %c0_i32_11 : i32
    scf.if %18 {
      %c0_14 = arith.constant 0 : index
      %c0_15 = arith.constant 0 : index
      %22 = vector.load %arg6[%c0_14, %c0_15] : memref<1x128xf32, #tpu.memory_space<vmem>>, vector<1x128xf32>
      %23 = vector.broadcast %22 : vector<1x128xf32> to vector<16x128xf32>
      %24 = arith.addf %15, %23 : vector<16x128xf32>
      %c0_16 = arith.constant 0 : index
      %c0_17 = arith.constant 0 : index
      %25 = vector.load %arg7[%c0_16, %c0_17] : memref<16x128xf32, #tpu.memory_space<vmem>>, vector<16x128xf32>
      tpu.vector_store %arg7[%c0_16, %c0_17], %24 {strides = array<i32>} : memref<16x128xf32, #tpu.memory_space<vmem>>, vector<16x128xf32>,
    } else {
    }
    %c0_i32_12 = arith.constant 0 : i32
    %19 = arith.cmpi sgt, %arg1, %c0_i32_12 : i32
    %20 = arith.extui %19 : i1 to i32
    %c0_i32_13 = arith.constant 0 : i32
    %21 = arith.cmpi ne, %20, %c0_i32_13 : i32
    scf.if %21 {
      %c0_14 = arith.constant 0 : index
      %c0_15 = arith.constant 0 : index
      %22 = vector.load %arg7[%c0_14, %c0_15] : memref<16x128xf32, #tpu.memory_space<vmem>>, vector<16x128xf32>
      %23 = arith.addf %22, %15 : vector<16x128xf32>
      %c0_16 = arith.constant 0 : index
      %c0_17 = arith.constant 0 : index
      %24 = vector.load %arg7[%c0_16, %c0_17] : memref<16x128xf32, #tpu.memory_space<vmem>>, vector<16x128xf32>
      tpu.vector_store %arg7[%c0_16, %c0_17], %23 {strides = array<i32>} : memref<16x128xf32, #tpu.memory_space<vmem>>, vector<16x128xf32>,
    } else {
    }
    return
  }
  func.func @transform_0(%arg0: i32, %arg1: i32) -> (i32, i32) {
    %c0_i32 = arith.constant 0 : i32
    %c0_i32_0 = arith.constant 0 : i32
    return %arg0, %c0_i32 : i32, i32
  }
  func.func @transform_1(%arg0: i32, %arg1: i32) -> (i32, i32) {
    %c0_i32 = arith.constant 0 : i32
    %c0_i32_0 = arith.constant 0 : i32
    return %c0_i32, %arg1 : i32, i32
  }
  func.func @transform_2(%arg0: i32, %arg1: i32) -> (i32, i32) {
    %c0_i32 = arith.constant 0 : i32
    %c0_i32_0 = arith.constant 0 : i32
    return %c0_i32, %arg1 : i32, i32
  }
  func.func @transform_3(%arg0: i32, %arg1: i32) -> (i32, i32) {
    %c0_i32 = arith.constant 0 : i32
    %c0_i32_0 = arith.constant 0 : i32
    return %arg1, %c0_i32 : i32, i32
  }
  func.func @transform_4(%arg0: i32, %arg1: i32) -> (i32, i32) {
    %c0_i32 = arith.constant 0 : i32
    %c0_i32_0 = arith.constant 0 : i32
    %c0_i32_1 = arith.constant 0 : i32
    return %c0_i32, %c0_i32_0 : i32, i32
  }
  func.func @transform_5(%arg0: i32, %arg1: i32) -> (i32, i32) {
    %c0_i32 = arith.constant 0 : i32
    %c0_i32_0 = arith.constant 0 : i32
    return %arg0, %c0_i32 : i32, i32
  }
}

</mosaic_0001>

<bundles_post_ra>
// kernel: tpu_custom_call.1
= control target key start
LH: loop header
LB: loop body
LE: loop exit
PB: predicated region body
PF: predicated region fallthrough
CT: control target
= control target key end

     0   :  { %10 = vsyncpa [#allocation3], 0  ;;  %s691_s0 = inlined_call_operand.hbm [shape: f32[16,128], index: 0, kind: input, shape index: {}]   ;;  %s692_s1 = inlined_call_operand.hbm [shape: f32[128,128], index: 1, kind: input, shape index: {}]   ;;  %s693_s2 = inlined_call_operand.vmem [shape: f32[1,128], index: 2, kind: input, shape index: {}]   ;;  %s694_s3 = inlined_call_operand.hbm [shape: f32[128,128], index: 3, kind: input, shape index: {}]   ;;  %s695_s4 = inlined_call_operand.vmem [shape: f32[1,128], index: 4, kind: input, shape index: {}]   ;;  %s696_s5 = inlined_call_operand.hbm [shape: f32[16,128], index: 5, kind: output, shape index: {}]  }
   0x1   :  { %11 = vsyncpa [#allocation6], 0 }
   0x2   :  { %12 = vsyncpa [#allocation4], 0  ;;  %s582_s18 = smov [#allocation5]   ;;  %s583_s20 = smov [#allocation2]  }
   0x3   :  { %s30_s19 = sshll.u32 %s582_s18, 4  ;;  %s18_s21 = sshll.u32 %s583_s20, 4  ;;  %s31_s19 = int_to_ptr.vmem [resolvable:$true] %s30_s19  ;;  %s618_s21 = int_to_ptr.vmem [resolvable:$true] %s18_s21 }
   0x4   :  { %s488_s24 = scalar_lea.hbm %s692_s1, 2048 }
   0x5   :  { %p489_p0 = scmp.ne.s32.totalorder %s692_s1, %s488_s24  ;;  %p492_p1 = scmp.lt.u32.totalorder %s488_s24, %s692_s1 }
   0x7   :  { %p494_p2 = pnand %p492_p1, %p489_p0 }
   0x9   :  { %497 = shalt.err (!%p494_p2)
}
   0xa   :  { %s498_s29 = scalar_lea.vmem %s31_s19, 2048  ;;  %p503_p4 = scmp.lt.s32.totalorder %s31_s19, %s31_s19 }
   0xb   :  { %p499_p3 = scmp.ne.s32.totalorder %s31_s19, %s498_s29  ;;  %p504_p5 = scmp.lt.s32.totalorder %s498_s29, %s498_s29 }
   0xd   :  { %p505_p6 = por %p504_p5, %p503_p4 }
   0xf   :  { %p506_p7 = pnand %p505_p6, %p499_p3 }
  0x11   :  { %509 = shalt.err (!%p506_p7)
}
  0x12   :  { %s584_s30 = smov 128   ;;  %s585_s6 = smov 8  }
  0x13   :  { %36 = dma.hbm_to_vmem [thread:$0]  %s692_s1, 2048, %s31_s19, [#allocation6], %s584_s30, %s584_s30, %s585_s6  }
  0x14   :  { %s510_s11 = scalar_lea.hbm %s691_s0, 256 }
  0x15   :  { %p511_p8 = scmp.ne.s32.totalorder %s691_s0, %s510_s11  ;;  %p514_p9 = scmp.lt.u32.totalorder %s510_s11, %s691_s0 }
  0x17   :  { %p516_p10 = pnand %p514_p9, %p511_p8 }
  0x19   :  { %519 = shalt.err (!%p516_p10)
}
  0x1a   :  { %s520_s16 = scalar_lea.vmem %s618_s21, 256  ;;  %p525_p12 = scmp.lt.s32.totalorder %s618_s21, %s618_s21 }
  0x1b   :  { %p521_p11 = scmp.ne.s32.totalorder %s618_s21, %s520_s16  ;;  %p526_p13 = scmp.lt.s32.totalorder %s520_s16, %s520_s16 }
  0x1d   :  { %p527_p0 = por %p526_p13, %p525_p12 }
  0x1f   :  { %p528_p1 = pnand %p527_p0, %p521_p11 }
  0x21   :  { %531 = shalt.err (!%p528_p1)
}
  0x22   :  { %24 = dma.hbm_to_vmem [thread:$0]  %s691_s0, 256, %s618_s21, [#allocation3], %s584_s30, %s584_s30, %s585_s6  }
  0x23   :  { %s586_s18 = smov [#allocation7]   ;;  %s532_s23 = scalar_lea.hbm %s694_s3, 2048 }
  0x24   :  { %s44_s19 = sshll.u32 %s586_s18, 4  ;;  %p533_p2 = scmp.ne.s32.totalorder %s694_s3, %s532_s23  ;;  %s45_s19 = int_to_ptr.vmem [resolvable:$true] %s44_s19 }
  0x25   :  { %p536_p3 = scmp.lt.u32.totalorder %s532_s23, %s694_s3 }
  0x27   :  { %p538_p4 = pnand %p536_p3, %p533_p2 }
  0x29   :  { %541 = shalt.err (!%p538_p4)
}
  0x2a   :  { %s542_s28 = scalar_lea.vmem %s45_s19, 2048  ;;  %p547_p6 = scmp.lt.s32.totalorder %s45_s19, %s45_s19 }
  0x2b   :  { %p543_p5 = scmp.ne.s32.totalorder %s45_s19, %s542_s28  ;;  %p548_p7 = scmp.lt.s32.totalorder %s542_s28, %s542_s28 }
  0x2d   :  { %p549_p8 = por %p548_p7, %p547_p6 }
  0x2f   :  { %p550_p9 = pnand %p549_p8, %p543_p5 }
  0x31   :  { %553 = shalt.err (!%p550_p9)
}
  0x32   :  { %50 = dma.hbm_to_vmem [thread:$0]  %s694_s3, 2048, %s45_s19, [#allocation6], %s584_s30, %s584_s30, %s585_s6  }
  0x33   :  { %576 = dma.done.wait [#allocation3], 256  }
  0x34   :  { %577 = vsyncadd [#allocation3], 4294967040 }
  0x35   :  { %578 = dma.done.wait [#allocation6], 4096  }
  0x36   :  { %579 = vsyncadd [#allocation6], 4294963200  ;;  %v64_v0 = vld [vmem:[#allocation5] sm:$0xff]  ;;  %v65_v1 = vld [vmem:[#allocation5 + $0x8] sm:$0xff]  ;;  %s587_s8 = smov [#allocation8]  }
  0x37   :  { %v66_v2 = vld [vmem:[#allocation5 + $0x10] sm:$0xff]  ;;  %v414_v3 = vpack.c.bf16 %v65_v1, %v64_v0  ;;  %v67_v4 = vld [vmem:[#allocation5 + $0x18] sm:$0xff]  ;;  %v68_v6 = vld [vmem:[#allocation5 + $0x20] sm:$0xff]  ;;  %s293_s9 = sshll.u32 %s587_s8, 4  ;;  %s294_s9 = int_to_ptr.vmem [resolvable:$true] %s293_s9 }
  0x38   :  { %v418_v5 = vpack.c.bf16 %v67_v4, %v66_v2  ;;  %v69_v7 = vld [vmem:[#allocation5 + $0x28] sm:$0xff]  ;;  %v70_v9 = vld [vmem:[#allocation5 + $0x30] sm:$0xff]  ;;  %v71_v10 = vld [vmem:[#allocation5 + $0x38] sm:$0xff]  ;;  %s554_s10 = scalar_lea.vmem %s294_s9, 256  ;;  %p559_p11 = scmp.lt.s32.totalorder %s294_s9, %s294_s9 }
  0x39   :  { %415 = vmatprep.subr.bf16.mxu0 %v414_v3  ;;  %v422_v8 = vpack.c.bf16 %v69_v7, %v68_v6  ;;  %v62_v11 = vld [vmem:[#allocation2] sm:$0xff]  ;;  %v172_v12 = vld [vmem:[#allocation7] sm:$0xff]  ;;  %v173_v13 = vld [vmem:[#allocation7 + $0x8] sm:$0xff]  ;;  %v426_v20 = vpack.c.bf16 %v71_v10, %v70_v9  ;;  %p555_p10 = scmp.ne.s32.totalorder %s294_s9, %s554_s10  ;;  %p560_p12 = scmp.lt.s32.totalorder %s554_s10, %s554_s10 }
  0x3a   :  { %417 = vmatpush3.bf16.msra.mxu0 %v414_v3  ;;  %376 = vmatprep.mubr.f32.mxu0 %v62_v11  ;;  %v174_v14 = vld [vmem:[#allocation7 + $0x10] sm:$0xff]  ;;  %v446_v15 = vpack.c.bf16 %v173_v13, %v172_v12  ;;  %v175_v16 = vld [vmem:[#allocation7 + $0x18] sm:$0xff]  ;;  %v176_v18 = vld [vmem:[#allocation7 + $0x20] sm:$0xff] }
  0x3b   :  { %419 = vmatprep.subr.bf16.mxu0 %v418_v5  ;;  %v450_v17 = vpack.c.bf16 %v175_v16, %v174_v14  ;;  %v177_v19 = vld [vmem:[#allocation7 + $0x28] sm:$0xff]  ;;  %v72_v21 = vld [vmem:[#allocation5 + $0x40] sm:$0xff]  ;;  %v74_v25 = vld [vmem:[#allocation5 + $0x50] sm:$0xff]  ;;  %p561_p13 = por %p560_p12, %p559_p11 }
  0x3c   :  { %447 = vmatprep.subr.bf16.mxu1 %v446_v15  ;;  %v73_v22 = vld [vmem:[#allocation5 + $0x48] sm:$0xff]  ;;  %v454_v23 = vpack.c.bf16 %v177_v19, %v176_v18  ;;  %v75_v26 = vld [vmem:[#allocation5 + $0x58] sm:$0xff]  ;;  %v76_v28 = vld [vmem:[#allocation5 + $0x60] sm:$0xff] }
  0x3d   :  { %449 = vmatpush3.bf16.msra.mxu1 %v446_v15  ;;  %v430_v24 = vpack.c.bf16 %v73_v22, %v72_v21  ;;  %v434_v27 = vpack.c.bf16 %v75_v26, %v74_v25  ;;  %v77_v29 = vld [vmem:[#allocation5 + $0x68] sm:$0xff]  ;;  %v78_v31 = vld [vmem:[#allocation5 + $0x70] sm:$0xff]  ;;  %v79_v32 = vld [vmem:[#allocation5 + $0x78] sm:$0xff]  ;;  %p562_p0 = pnand %p561_p13, %p555_p10 }
  0x3e   :  { %421 = vmatpush3.bf16.msra.mxu0 %v418_v5  ;;  %451 = vmatprep.subr.bf16.mxu1 %v450_v17  ;;  %v438_v30 = vpack.c.bf16 %v77_v29, %v76_v28  ;;  %v442_v33 = vpack.c.bf16 %v79_v32, %v78_v31  ;;  %v63_v34 = vld [vmem:[#allocation2 + $0x8] sm:$0xff]  ;;  %v178_v35 = vld [vmem:[#allocation7 + $0x30] sm:$0xff]  ;;  %v180_v38 = vld [vmem:[#allocation7 + $0x40] sm:$0xff] }
  0x3f   :  { %423 = vmatprep.subr.bf16.mxu0 %v422_v8  ;;  %v179_v36 = vld [vmem:[#allocation7 + $0x38] sm:$0xff]  ;;  %v181_v39 = vld [vmem:[#allocation7 + $0x48] sm:$0xff]  ;;  %v182_v41 = vld [vmem:[#allocation7 + $0x50] sm:$0xff] }
  0x40   :  { %v458_v37 = vpack.c.bf16 %v179_v36, %v178_v35  ;;  %v462_v40 = vpack.c.bf16 %v181_v39, %v180_v38  ;;  %v183_v42 = vld [vmem:[#allocation7 + $0x58] sm:$0xff]  ;;  %v184_v44 = vld [vmem:[#allocation7 + $0x60] sm:$0xff]  ;;  %v185_v45 = vld [vmem:[#allocation7 + $0x68] sm:$0xff] }
  0x41   :  { %453 = vmatpush3.bf16.msra.mxu1 %v450_v17  ;;  %v466_v43 = vpack.c.bf16 %v183_v42, %v182_v41  ;;  %v470_v46 = vpack.c.bf16 %v185_v45, %v184_v44  ;;  %v186_v47 = vld [vmem:[#allocation7 + $0x70] sm:$0xff]  ;;  %v187_v48 = vld [vmem:[#allocation7 + $0x78] sm:$0xff] }
  0x42   :  { %425 = vmatpush3.bf16.msra.mxu0 %v422_v8  ;;  %455 = vmatprep.subr.bf16.mxu1 %v454_v23  ;;  %v474_v49 = vpack.c.bf16 %v187_v48, %v186_v47  ;;  %v306_v50 = vld [vmem:[%s693_s2] ss:$0 sm:$0xff] }
  0x43   :  { %427 = vmatprep.subr.bf16.mxu0 %v426_v20  ;;  %v307_v1 = vld [vmem:[%s695_s4] ss:$0 sm:$0xff] }
  0x45   :  { %457 = vmatpush3.bf16.msra.mxu1 %v454_v23 }
  0x46   :  { %429 = vmatpush3.bf16.msra.mxu0 %v426_v20  ;;  %459 = vmatprep.subr.bf16.mxu1 %v458_v37 }
  0x47   :  { %431 = vmatprep.subr.bf16.mxu0 %v430_v24 }
  0x49   :  { %461 = vmatpush3.bf16.msra.mxu1 %v458_v37 }
  0x4a   :  { %433 = vmatpush3.bf16.msra.mxu0 %v430_v24  ;;  %463 = vmatprep.subr.bf16.mxu1 %v462_v40 }
  0x4b   :  { %435 = vmatprep.subr.bf16.mxu0 %v434_v27 }
  0x4d   :  { %465 = vmatpush3.bf16.msra.mxu1 %v462_v40 }
  0x4e   :  { %437 = vmatpush3.bf16.msra.mxu0 %v434_v27  ;;  %467 = vmatprep.subr.bf16.mxu1 %v466_v43 }
  0x4f   :  { %439 = vmatprep.subr.bf16.mxu0 %v438_v30 }
  0x51   :  { %469 = vmatpush3.bf16.msra.mxu1 %v466_v43 }
  0x52   :  { %441 = vmatpush3.bf16.msra.mxu0 %v438_v30  ;;  %471 = vmatprep.subr.bf16.mxu1 %v470_v46 }
  0x53   :  { %443 = vmatprep.subr.bf16.mxu0 %v442_v33 }
  0x55   :  { %473 = vmatpush3.bf16.msra.mxu1 %v470_v46 }
  0x56   :  { %445 = vmatpush3.bf16.msra.mxu0 %v442_v33  ;;  %475 = vmatprep.subr.bf16.mxu1 %v474_v49 }
  0x59   :  { %377 = vmatmul.mubr.f32.vlgmr.msra.gmra.mrb[0].mxu0 %v63_v34  ;;  %477 = vmatpush3.bf16.msra.mxu1 %v474_v49 }
 0x12c   :  { %v378_v51 = vpop.f32.mrb[0].mxu0 }
 0x12d   :  { %v159_v52 = vadd.f32 %v378_v51, %v306_v50  ;;  %v153_v53 = vpop.f32.mrb[1].mxu0 }
 0x12e   :  { %v154_v54 = vadd.f32 %v306_v50, %v153_v53 }
 0x12f   :  { %v165_v55 = vmul.f32 0.70710677, %v159_v52  ;;  %v163_v62 = vmul.f32 0.5, %v159_v52 }
 0x130   :  { %v164_v56 = vmul.f32 0.70710677, %v154_v54  ;;  %v162_v60 = vmul.f32 0.5, %v154_v54 }
 0x131   :  { %484 = verf.f32 %v165_v55 }
 0x132   :  { %486 = verf.f32 %v164_v56 }
 0x13b   :  { %v485_v57 = vpop.eup %484 }
 0x13c   :  { %v487_v58 = vpop.eup %486  ;;  %v169_v59 = vadd.f32 1.0, %v485_v57 }
 0x13d   :  { %v168_v61 = vadd.f32 1.0, %v487_v58 }
 0x13e   :  { %v171_v0 = vmul.f32 %v169_v59, %v163_v62 }
 0x13f   :  { %v170_v63 = vmul.f32 %v168_v61, %v162_v60 }
 0x141   :  { %411 = vmatprep.mubr.f32.mxu1 %v170_v63 }
 0x142   :  { %412 = vmatmul.mubr.f32.vlgmr.msra.gmra.mrb[0].mxu1 %v171_v0 }
 0x215   :  { %v413_v2 = vpop.f32.mrb[0].mxu1 }
 0x216   :  { %v275_v3 = vadd.f32 %v413_v2, %v307_v1  ;;  %v254_v4 = vpop.f32.mrb[1].mxu1 }
 0x217   :  { %v274_v5 = vadd.f32 %v307_v1, %v254_v4 }
 0x218   :  { %277 = vst [vmem:[#allocation8 + $0x8] sm:$0xff] %v275_v3 }
 0x219   :  { %276 = vst [vmem:[#allocation8] sm:$0xff] %v274_v5 }
 0x21a   :  { %565 = shalt.err (!%p562_p0)
}
 0x21b   :  { %s566_s4 = scalar_lea.hbm %s696_s5, 256 }
 0x21c   :  { %p567_p1 = scmp.ne.s32.totalorder %s696_s5, %s566_s4  ;;  %p570_p2 = scmp.lt.u32.totalorder %s566_s4, %s696_s5 }
 0x21e   :  { %p572_p3 = pnand %p570_p2, %p567_p1 }
 0x220   :  { %575 = shalt.err (!%p572_p3)
}
 0x221   :  { %299 = dma.vmem_to_hbm [thread:$0]  %s294_s9, 256, %s696_s5, [#allocation4], %s584_s30, %s584_s30, %s585_s6  }
 0x222   :  { %580 = dma.done.wait [#allocation4], 256  }
 0x223   :  { %581 = vsyncadd [#allocation4], 4294967040 }
 0x224   :  { %303 = vsyncpa [#allocation3], 1 }
 0x225   :  { %304 = vsyncpa [#allocation6], 1 }
 0x226   :  { %305 = vsyncpa [#allocation4], 1 }

</bundles_post_ra>
